<compile_context>
chip_gen: v7x
topology: tpu7x:2x2x1
jax: 0.10.0
libtpu: 0.0.40
codegen_flags: <defaults>
</compile_context>

<pallas_src>
from functools import partial

import jax
import jax.numpy as jnp
from jax.experimental import pallas as pl
from jax.experimental.pallas import tpu as pltpu

LANE = 128


# ---------------------------------------------------------------------------
# Pallas kernel: one-hot "embedding", one LSTM cell step, fc projection.
# ---------------------------------------------------------------------------
def lstm_fc_kernel(tok_ref, h_ref, c_ref, wg_ref, b_ref, wfc_ref, bfc_ref,
                   logits_ref, h_out_ref, c_out_ref):
    """Refs:
      tok_ref : VMEM [B, 1]      int32  token ids
      h_ref   : VMEM [B, H]      f32    previous hidden state
      c_ref   : VMEM [B, H]      f32    previous cell state
      wg_ref  : VMEM [Vp+H, 4H]  bf16   fused [emb @ W_ih^T (padded) ; W_hh^T],
                                        gate column order (i, f, o, g)
      b_ref   : VMEM [1, 4H]     f32    b_ih + b_hh, same gate order
      wfc_ref : VMEM [H, Vo]     bf16   fc weight^T, V padded to lane multiple
      bfc_ref : VMEM [1, Vo]     f32    fc bias, padded
      outputs : logits [B, Vo], h_new [B, H], c_new [B, H]  (f32, lane-dense)
    """
    B, H = h_ref.shape
    Vp = wg_ref.shape[0] - H

    # One-hot token rows (replaces the serialized per-row embedding gather).
    # Out-of-range ids produce an all-zero row -> no OOB VMEM access.
    tok = tok_ref[...]                                          # [B, 1] i32
    lanes = jax.lax.broadcasted_iota(jnp.int32, (B, Vp), 1)     # [B, Vp]
    onehot = (lanes == tok).astype(jnp.bfloat16)                # [B, Vp]

    # Fused activation [onehot | h] -> single MXU matmul, f32 accumulation.
    xh = jnp.concatenate([onehot, h_ref[...].astype(jnp.bfloat16)], axis=-1)
    gates = jnp.dot(xh, wg_ref[...],
                    preferred_element_type=jnp.float32) + b_ref[...]

    # Gate order (i, f, o, g): one EUP sigmoid pass over [B, 3H], one tanh
    # over [B, H].  All elementwise math in f32.
    sig = jax.nn.sigmoid(gates[:, :3 * H])
    i_g = sig[:, 0 * H:1 * H]
    f_g = sig[:, 1 * H:2 * H]
    o_g = sig[:, 2 * H:3 * H]
    g_g = jnp.tanh(gates[:, 3 * H:])

    c_new = f_g * c_ref[...] + i_g * g_g
    h_new = o_g * jnp.tanh(c_new)
    c_out_ref[...] = c_new
    h_out_ref[...] = h_new

    # fc: logits = h_new @ W_fc^T + b_fc, lane-dense padded output [B, Vo].
    logits_ref[...] = jnp.dot(h_new.astype(jnp.bfloat16), wfc_ref[...],
                              preferred_element_type=jnp.float32) + bfc_ref[...]


# ---------------------------------------------------------------------------
# Parameter construction (deterministic, synthetic) and kernel-side packing.
# ---------------------------------------------------------------------------
def init_raw_params(key, vocab_size, embed_dim, hidden):
    """Raw f32 parameters in PyTorch layout / gate order (i, f, g, o)."""
    ks = jax.random.split(key, 7)
    s = 0.1
    return {
        "embedding": s * jax.random.normal(ks[0], (vocab_size, embed_dim), jnp.float32),
        "w_ih_t": s * jax.random.normal(ks[1], (embed_dim, 4 * hidden), jnp.float32),
        "w_hh_t": s * jax.random.normal(ks[2], (hidden, 4 * hidden), jnp.float32),
        # Only b_ih + b_hh matters in the forward.
        "b": (s * jax.random.normal(ks[3], (1, 4 * hidden), jnp.float32)
              + s * jax.random.normal(ks[4], (1, 4 * hidden), jnp.float32)),
        "w_fc_t": s * jax.random.normal(ks[5], (hidden, vocab_size), jnp.float32),
        "b_fc": s * jax.random.normal(ks[6], (1, vocab_size), jnp.float32),
    }


def _reorder_ifgo_to_ifog(w):
    """Reorder the 4H gate columns (i, f, g, o) -> (i, f, o, g)."""
    i, f, g, o = jnp.split(w, 4, axis=-1)
    return jnp.concatenate([i, f, o, g], axis=-1)


def prepare_kernel_params(raw):
    """Fold embedding into W_ih, reorder gates, pad fc to lane multiples."""
    V, _ = raw["embedding"].shape
    H = raw["w_hh_t"].shape[0]
    Vp = pl.cdiv(V, LANE) * LANE

    # Fold the embedding away: onehot @ (emb @ W_ih^T) == emb[tok] @ W_ih^T.
    emb_gates = raw["embedding"] @ raw["w_ih_t"]                  # f32 [V, 4H]
    emb_gates_p = jnp.zeros((Vp, 4 * H), jnp.float32).at[:V].set(emb_gates)
    w_gates = jnp.concatenate([emb_gates_p, raw["w_hh_t"]], axis=0)  # [Vp+H, 4H]
    w_gates = _reorder_ifgo_to_ifog(w_gates).astype(jnp.bfloat16)
    b = _reorder_ifgo_to_ifog(raw["b"])

    # Lane-dense fc: pad V up to a multiple of 128 with zero columns.
    Vo = pl.cdiv(V, LANE) * LANE
    w_fc = jnp.zeros((H, Vo), jnp.float32).at[:, :V].set(raw["w_fc_t"])
    b_fc = jnp.zeros((1, Vo), jnp.float32).at[:, :V].set(raw["b_fc"])

    return {
        "w_gates": w_gates,                 # bf16 [Vp+H, 4H]
        "b": b,                             # f32  [1, 4H]
        "w_fc": w_fc.astype(jnp.bfloat16),  # bf16 [H, Vo]
        "b_fc": b_fc,                       # f32  [1, Vo]
    }


# ---------------------------------------------------------------------------
# Wrapper: everything hot in one Pallas call; state donated & aliased in place.
# ---------------------------------------------------------------------------
@partial(jax.jit, static_argnames=("vocab_size",), donate_argnums=(2, 3))
def rnn_forward(params, x_tokens, hidden, cell, *, vocab_size):
    """x_tokens: int32 [B]; hidden/cell: float32 [1, B, H] (PyTorch layout)."""
    B = x_tokens.shape[0]
    H = hidden.shape[-1]
    Vo = params["b_fc"].shape[-1]
    h0, c0 = hidden[0], cell[0]
    tok = x_tokens.astype(jnp.int32).reshape(B, 1)

    vmem = pl.BlockSpec(memory_space=pltpu.MemorySpace.VMEM)

    logits_p, h1, c1 = pl.pallas_call(
        lstm_fc_kernel,
        out_shape=(
            jax.ShapeDtypeStruct((B, Vo), jnp.float32),
            jax.ShapeDtypeStruct((B, H), jnp.float32),
            jax.ShapeDtypeStruct((B, H), jnp.float32),
        ),
        in_specs=[vmem] * 7,
        out_specs=(vmem, vmem, vmem),
        # Recurrent state updated in place: h0 -> h_new, c0 -> c_new.
        input_output_aliases={1: 1, 2: 2},
    )(tok, h0, c0, params["w_gates"], params["b"], params["w_fc"], params["b_fc"])

    # Match PyTorch return shapes: out [B, V], hidden/cell [1, B, H].
    return logits_p[:, :vocab_size], h1[None, ...], c1[None, ...]


# ---------------------------------------------------------------------------
# Pure-JAX f32 reference with faithful PyTorch semantics (embedding gather,
# torch gate order) on the raw parameters.
# ---------------------------------------------------------------------------
def rnn_forward_ref(raw, x_tokens, hidden, cell):
    h, c = hidden[0], cell[0]
    H = h.shape[-1]
    x_emb = jnp.take(raw["embedding"], x_tokens, axis=0)
    gates = x_emb @ raw["w_ih_t"] + h @ raw["w_hh_t"] + raw["b"]
    i_g = jax.nn.sigmoid(gates[:, 0 * H:1 * H])
    f_g = jax.nn.sigmoid(gates[:, 1 * H:2 * H])
    g_g = jnp.tanh(gates[:, 2 * H:3 * H])
    o_g = jax.nn.sigmoid(gates[:, 3 * H:4 * H])
    c_new = f_g * c + i_g * g_g
    h_new = o_g * jnp.tanh(c_new)
    logits = h_new @ raw["w_fc_t"] + raw["b_fc"]
    return logits, h_new[None, ...], c_new[None, ...]


if __name__ == "__main__":
    # Small shapes consistent with the module (vocab/embed/hidden scaled down;
    # batch = 16 fills a bf16 sublane tile, hidden is a lane multiple).
    batch = 16
    vocab_size = 80          # ~ len(char_array) in the original script
    embed_dim = 128
    rnn_hidden_size = 128

    key = jax.random.PRNGKey(0)
    kp, kx, kh, kc = jax.random.split(key, 4)
    raw = init_raw_params(kp, vocab_size, embed_dim, rnn_hidden_size)
    params = prepare_kernel_params(raw)

    x = jax.random.randint(kx, (batch,), 0, vocab_size, dtype=jnp.int32)
    # init_hidden(batch) gives zeros; use small random state here to also
    # exercise the recurrent (h, c) paths.
    hidden = 0.1 * jax.random.normal(kh, (1, batch, rnn_hidden_size), jnp.float32)
    cell = 0.1 * jax.random.normal(kc, (1, batch, rnn_hidden_size), jnp.float32)

    # Reference first: hidden/cell buffers are donated to the Pallas call.
    out_r, h1_r, c1_r = rnn_forward_ref(raw, x, hidden, cell)

    out, h1, c1 = rnn_forward(params, x, hidden, cell, vocab_size=vocab_size)
    jax.block_until_ready((out, h1, c1))

    assert out.shape == (batch, vocab_size)
    assert h1.shape == (1, batch, rnn_hidden_size)
    assert c1.shape == (1, batch, rnn_hidden_size)
    assert jnp.allclose(out, out_r, atol=1e-2), "logits mismatch"
    assert jnp.allclose(h1, h1_r, atol=5e-3), "hidden mismatch"
    assert jnp.allclose(c1, c1_r, atol=5e-3), "cell mismatch"

    print("KERNEL_OK")
</pallas_src>

<mosaic_0001>
module attributes {stable_mosaic.version = 11 : i64} {
  func.func @lstm_fc_kernel(%arg0: memref<16x1xi32, #tpu.memory_space<vmem>>, %arg1: memref<16x128xf32, #tpu.memory_space<vmem>>, %arg2: memref<16x128xf32, #tpu.memory_space<vmem>>, %arg3: memref<256x512xbf16, #tpu.memory_space<vmem>>, %arg4: memref<1x512xf32, #tpu.memory_space<vmem>>, %arg5: memref<128x128xbf16, #tpu.memory_space<vmem>>, %arg6: memref<1x128xf32, #tpu.memory_space<vmem>>, %arg7: memref<16x128xf32, #tpu.memory_space<vmem>>, %arg8: memref<16x128xf32, #tpu.memory_space<vmem>>, %arg9: memref<16x128xf32, #tpu.memory_space<vmem>>) attributes {dimension_semantics = [], scalar_prefetch = 0 : i64, scratch_operands = 0 : i64, tpu.core_type = #tpu.core_type<tc>} {
    %c0 = arith.constant 0 : index
    %c0_0 = arith.constant 0 : index
    %0 = vector.load %arg0[%c0, %c0_0] : memref<16x1xi32, #tpu.memory_space<vmem>>, vector<16x1xi32>
    %1 = tpu.iota {dimensions = array<i32: 1>} : vector<16x128xi32>
    %2 = vector.broadcast %0 : vector<16x1xi32> to vector<16x128xi32>
    %3 = arith.cmpi eq, %1, %2 : vector<16x128xi32>
    %4 = arith.extui %3 : vector<16x128xi1> to vector<16x128xi32>
    %5 = arith.sitofp %4 : vector<16x128xi32> to vector<16x128xf32>
    %6 = arith.truncf %5 : vector<16x128xf32> to vector<16x128xbf16>
    %c0_1 = arith.constant 0 : index
    %c0_2 = arith.constant 0 : index
    %7 = vector.load %arg1[%c0_1, %c0_2] : memref<16x128xf32, #tpu.memory_space<vmem>>, vector<16x128xf32>
    %8 = arith.truncf %7 : vector<16x128xf32> to vector<16x128xbf16>
    %9 = tpu.concatenate %6, %8 in 1 : vector<16x128xbf16>, vector<16x128xbf16> -> vector<16x256xbf16>
    %c0_3 = arith.constant 0 : index
    %c0_4 = arith.constant 0 : index
    %10 = vector.load %arg3[%c0_3, %c0_4] : memref<256x512xbf16, #tpu.memory_space<vmem>>, vector<256x512xbf16>
    %cst = arith.constant dense<0.000000e+00> : vector<16x512xf32>
    %11 = tpu.matmul %9, %10, %cst {dimension_numbers = #tpu.dot_dimension_numbers<[1], [0], [0], [1], [0, 0, 1, 1], [], []>} : vector<16x256xbf16>, vector<256x512xbf16>, vector<16x512xf32> -> vector<16x512xf32>
    %c0_5 = arith.constant 0 : index
    %c0_6 = arith.constant 0 : index
    %12 = vector.load %arg4[%c0_5, %c0_6] : memref<1x512xf32, #tpu.memory_space<vmem>>, vector<1x512xf32>
    %13 = vector.broadcast %12 : vector<1x512xf32> to vector<16x512xf32>
    %14 = arith.addf %11, %13 : vector<16x512xf32>
    %15 = vector.extract_strided_slice %14 {offsets = [0, 0], sizes = [16, 384], strides = [1, 1]} : vector<16x512xf32> to vector<16x384xf32>
    %16 = arith.negf %15 : vector<16x384xf32>
    %17 = math.exp %16 : vector<16x384xf32>
    %cst_7 = arith.constant 1.000000e+00 : f32
    %18 = vector.broadcast %cst_7 : f32 to vector<16x384xf32>
    %19 = arith.addf %18, %17 : vector<16x384xf32>
    %20 = arith.divf %18, %19 : vector<16x384xf32>
    %21 = vector.extract_strided_slice %20 {offsets = [0, 0], sizes = [16, 128], strides = [1, 1]} : vector<16x384xf32> to vector<16x128xf32>
    %22 = vector.extract_strided_slice %20 {offsets = [0, 128], sizes = [16, 128], strides = [1, 1]} : vector<16x384xf32> to vector<16x128xf32>
    %23 = vector.extract_strided_slice %20 {offsets = [0, 256], sizes = [16, 128], strides = [1, 1]} : vector<16x384xf32> to vector<16x128xf32>
    %24 = vector.extract_strided_slice %14 {offsets = [0, 384], sizes = [16, 128], strides = [1, 1]} : vector<16x512xf32> to vector<16x128xf32>
    %25 = math.tanh %24 : vector<16x128xf32>
    %c0_8 = arith.constant 0 : index
    %c0_9 = arith.constant 0 : index
    %26 = vector.load %arg2[%c0_8, %c0_9] : memref<16x128xf32, #tpu.memory_space<vmem>>, vector<16x128xf32>
    %27 = arith.mulf %22, %26 : vector<16x128xf32>
    %28 = arith.mulf %21, %25 : vector<16x128xf32>
    %29 = arith.addf %27, %28 : vector<16x128xf32>
    %30 = math.tanh %29 : vector<16x128xf32>
    %31 = arith.mulf %23, %30 : vector<16x128xf32>
    %c0_10 = arith.constant 0 : index
    %c0_11 = arith.constant 0 : index
    %32 = vector.load %arg9[%c0_10, %c0_11] : memref<16x128xf32, #tpu.memory_space<vmem>>, vector<16x128xf32>
    tpu.vector_store %arg9[%c0_10, %c0_11], %29 {strides = array<i32>} : memref<16x128xf32, #tpu.memory_space<vmem>>, vector<16x128xf32>,
    %c0_12 = arith.constant 0 : index
    %c0_13 = arith.constant 0 : index
    %33 = vector.load %arg8[%c0_12, %c0_13] : memref<16x128xf32, #tpu.memory_space<vmem>>, vector<16x128xf32>
    tpu.vector_store %arg8[%c0_12, %c0_13], %31 {strides = array<i32>} : memref<16x128xf32, #tpu.memory_space<vmem>>, vector<16x128xf32>,
    %34 = arith.truncf %31 : vector<16x128xf32> to vector<16x128xbf16>
    %c0_14 = arith.constant 0 : index
    %c0_15 = arith.constant 0 : index
    %35 = vector.load %arg5[%c0_14, %c0_15] : memref<128x128xbf16, #tpu.memory_space<vmem>>, vector<128x128xbf16>
    %cst_16 = arith.constant dense<0.000000e+00> : vector<16x128xf32>
    %36 = tpu.matmul %34, %35, %cst_16 {dimension_numbers = #tpu.dot_dimension_numbers<[1], [0], [0], [1], [0, 0, 1, 1], [], []>} : vector<16x128xbf16>, vector<128x128xbf16>, vector<16x128xf32> -> vector<16x128xf32>
    %c0_17 = arith.constant 0 : index
    %c0_18 = arith.constant 0 : index
    %37 = vector.load %arg6[%c0_17, %c0_18] : memref<1x128xf32, #tpu.memory_space<vmem>>, vector<1x128xf32>
    %38 = vector.broadcast %37 : vector<1x128xf32> to vector<16x128xf32>
    %39 = arith.addf %36, %38 : vector<16x128xf32>
    %c0_19 = arith.constant 0 : index
    %c0_20 = arith.constant 0 : index
    %40 = vector.load %arg7[%c0_19, %c0_20] : memref<16x128xf32, #tpu.memory_space<vmem>>, vector<16x128xf32>
    tpu.vector_store %arg7[%c0_19, %c0_20], %39 {strides = array<i32>} : memref<16x128xf32, #tpu.memory_space<vmem>>, vector<16x128xf32>,
    return
  }
}

</mosaic_0001>

<bundles_post_ra>
// kernel: rnn_forward.1
= control target key start
LH: loop header
LB: loop body
LE: loop exit
PB: predicated region body
PF: predicated region fallthrough
CT: control target
= control target key end

     0   :  { %15 = vsyncpa [#allocation3], 0  ;;  %s1336_s0 = inlined_call_operand.vmem [shape: s32[16,1], index: 0, kind: input, shape index: {}]   ;;  %s1337_s1 = inlined_call_operand.vmem [shape: f32[16,128], index: 1, kind: input, shape index: {}, may-alias: {1,8}]   ;;  %s1338_s2 = inlined_call_operand.vmem [shape: f32[16,128], index: 2, kind: input, shape index: {}, may-alias: {2,9}]   ;;  %s1339_s3 = inlined_call_operand.hbm [shape: bf16[256,512], index: 3, kind: input, shape index: {}]   ;;  %s1340_s4 = inlined_call_operand.hbm [shape: f32[1,512], index: 4, kind: input, shape index: {}]   ;;  %s1341_s5 = inlined_call_operand.hbm [shape: bf16[128,128], index: 5, kind: input, shape index: {}]   ;;  %s1342_s6 = inlined_call_operand.hbm [shape: f32[1,128], index: 6, kind: input, shape index: {}]   ;;  %s1343_s7 = inlined_call_operand.hbm [shape: f32[16,128], index: 7, kind: output, shape index: {0}]   ;;  %s1344_s8 = inlined_call_operand.vmem [shape: f32[16,128], index: 8, kind: output, shape index: {1}, may-alias: {1,8}]   ;;  %s1345_s9 = inlined_call_operand.vmem [shape: f32[16,128], index: 9, kind: output, shape index: {2}, may-alias: {2,9}]  }
   0x1   :  { %16 = vsyncpa [#allocation6], 0 }
   0x2   :  { %17 = vsyncpa [#allocation9], 0 }
   0x3   :  { %18 = vsyncpa [#allocation4], 0  ;;  %s1174_s30 = smov [#allocation5]   ;;  %s1175_s11 = smov [#allocation2]  }
   0x4   :  { %s43_s10 = sshll.u32 %s1174_s30, 4  ;;  %s30_s12 = sshll.u32 %s1175_s11, 4  ;;  %s44_s10 = int_to_ptr.vmem [resolvable:$true] %s43_s10  ;;  %s1239_s12 = int_to_ptr.vmem [resolvable:$true] %s30_s12 }
   0x5   :  { %s1056_s15 = scalar_lea.hbm %s1340_s4, 64 }
   0x6   :  { %p1057_p0 = scmp.ne.s32.totalorder %s1340_s4, %s1056_s15  ;;  %p1060_p1 = scmp.lt.u32.totalorder %s1056_s15, %s1340_s4 }
   0x8   :  { %p1062_p2 = pnand %p1060_p1, %p1057_p0 }
   0xa   :  { %1065 = shalt.err (!%p1062_p2)
}
   0xb   :  { %s1066_s20 = scalar_lea.vmem %s44_s10, 64  ;;  %p1071_p4 = scmp.lt.s32.totalorder %s44_s10, %s44_s10 }
   0xc   :  { %p1067_p3 = scmp.ne.s32.totalorder %s44_s10, %s1066_s20  ;;  %p1072_p5 = scmp.lt.s32.totalorder %s1066_s20, %s1066_s20 }
   0xe   :  { %p1073_p6 = por %p1072_p5, %p1071_p4 }
  0x10   :  { %p1074_p7 = pnand %p1073_p6, %p1067_p3 }
  0x12   :  { %1077 = shalt.err (!%p1074_p7)
}
  0x13   :  { %46 = dma.hbm_to_vmem [thread:$0]  %s1340_s4, 64, %s44_s10, [#allocation6]  }
  0x14   :  { %s1078_s25 = scalar_lea.hbm %s1339_s3, 8192 }
  0x15   :  { %p1079_p8 = scmp.ne.s32.totalorder %s1339_s3, %s1078_s25  ;;  %p1082_p9 = scmp.lt.u32.totalorder %s1078_s25, %s1339_s3 }
  0x17   :  { %p1084_p10 = pnand %p1082_p9, %p1079_p8 }
  0x19   :  { %1087 = shalt.err (!%p1084_p10)
}
  0x1a   :  { %s1088_s30 = scalar_lea.vmem %s1239_s12, 8192  ;;  %p1093_p12 = scmp.lt.s32.totalorder %s1239_s12, %s1239_s12 }
  0x1b   :  { %p1089_p11 = scmp.ne.s32.totalorder %s1239_s12, %s1088_s30  ;;  %p1094_p13 = scmp.lt.s32.totalorder %s1088_s30, %s1088_s30 }
  0x1d   :  { %p1095_p0 = por %p1094_p13, %p1093_p12 }
  0x1f   :  { %p1096_p1 = pnand %p1095_p0, %p1089_p11 }
  0x21   :  { %1099 = shalt.err (!%p1096_p1)
}
  0x22   :  { %s1176_s4 = smov 256   ;;  %s1177_s10 = smov 16  }
  0x23   :  { %36 = dma.hbm_to_vmem [thread:$0]  %s1339_s3, 8192, %s1239_s12, [#allocation3], %s1176_s4, %s1176_s4, %s1177_s10  }
  0x24   :  { %s1178_s14 = smov [#allocation7]   ;;  %s1100_s18 = scalar_lea.hbm %s1341_s5, 1024 }
  0x25   :  { %s52_s15 = sshll.u32 %s1178_s14, 4  ;;  %p1101_p2 = scmp.ne.s32.totalorder %s1341_s5, %s1100_s18  ;;  %s53_s15 = int_to_ptr.vmem [resolvable:$true] %s52_s15 }
  0x26   :  { %p1104_p3 = scmp.lt.u32.totalorder %s1100_s18, %s1341_s5 }
  0x28   :  { %p1106_p4 = pnand %p1104_p3, %p1101_p2 }
  0x2a   :  { %1109 = shalt.err (!%p1106_p4)
}
  0x2b   :  { %s1110_s23 = scalar_lea.vmem %s53_s15, 1024  ;;  %p1115_p6 = scmp.lt.s32.totalorder %s53_s15, %s53_s15 }
  0x2c   :  { %p1111_p5 = scmp.ne.s32.totalorder %s53_s15, %s1110_s23  ;;  %p1116_p7 = scmp.lt.s32.totalorder %s1110_s23, %s1110_s23 }
  0x2e   :  { %p1117_p8 = por %p1116_p7, %p1115_p6 }
  0x30   :  { %p1118_p9 = pnand %p1117_p8, %p1111_p5 }
  0x32   :  { %1121 = shalt.err (!%p1118_p9)
}
  0x33   :  { %s1179_s3 = smov 64   ;;  %s1180_s12 = smov 4  }
  0x34   :  { %58 = dma.hbm_to_vmem [thread:$0]  %s1341_s5, 1024, %s53_s15, [#allocation6], %s1179_s3, %s1179_s3, %s1180_s12  }
  0x35   :  { %s1181_s26 = smov [#allocation8]   ;;  %s1122_s30 = scalar_lea.hbm %s1342_s6, 16 }
  0x36   :  { %s65_s27 = sshll.u32 %s1181_s26, 4  ;;  %p1123_p10 = scmp.ne.s32.totalorder %s1342_s6, %s1122_s30  ;;  %s66_s27 = int_to_ptr.vmem [resolvable:$true] %s65_s27 }
  0x37   :  { %p1126_p11 = scmp.lt.u32.totalorder %s1122_s30, %s1342_s6 }
  0x39   :  { %p1128_p12 = pnand %p1126_p11, %p1123_p10 }
  0x3b   :  { %1131 = shalt.err (!%p1128_p12)
}
  0x3c   :  { %s1132_s14 = scalar_lea.vmem %s66_s27, 16  ;;  %s1136_s5 = scalar_lea.vmem %s66_s27, 32 }
  0x3d   :  { %p1133_p13 = scmp.ne.s32.totalorder %s66_s27, %s1132_s14  ;;  %p1137_p0 = scmp.lt.s32.totalorder %s66_s27, %s66_s27 }
  0x3e   :  { %p1138_p1 = scmp.lt.s32.totalorder %s1136_s5, %s1132_s14 }
  0x40   :  { %p1139_p2 = por %p1138_p1, %p1137_p0 }
  0x42   :  { %p1140_p3 = pnand %p1139_p2, %p1133_p13 }
  0x44   :  { %1143 = shalt.err (!%p1140_p3)
}
  0x45   :  { %68 = dma.hbm_to_vmem [thread:$0]  %s1342_s6, 16, %s66_s27, [#allocation9]  }
  0x46   :  { %1166 = dma.done.wait [#allocation3], 8192  }
  0x47   :  { %1167 = vsyncadd [#allocation3], 4294959104 }
  0x48   :  { %1168 = dma.done.wait [#allocation6], 1088  }
  0x49   :  { %1169 = vsyncadd [#allocation6], 4294966208 }
  0x4a   :  { %1170 = dma.done.wait [#allocation9], 16  }
  0x4b   :  { %1171 = vsyncadd [#allocation9], 4294967280  ;;  %v1182_v0 = vmov 0   ;;  %v82_v1 = vld [vmem:[%s1336_s0] sm:$0xff]  ;;  %v83_v2 = vld [vmem:[%s1336_s0 + $0x8] sm:$0xff]  ;;  %vm1185_vm3 = vmmov 0  }
  0x4c   :  { %919 = vset.pattern.permute.xlu0 %v1182_v0  ;;  %v920_v3 = vld [vmem:[#allocation2 + $0x4] ss:$16 sps:$4 sm:$0xff]   ;;  %v922_v4 = vld [vmem:[#allocation2 + $0xc] ss:$16 sps:$4 sm:$0xff]   ;;  %v924_v5 = vld [vmem:[#allocation2] ss:$16 sps:$4 sm:$0xff]  }
  0x4d   :  { %87 = vperm.xlu0 %919, %v82_v1   ;;  %508 = vmatprep.subr.bf16.mxu0 %v920_v3  ;;  %v925_v6 = vld [vmem:[#allocation2 + $0x8] ss:$16 sps:$4 sm:$0xff]   ;;  %v926_v7 = vld [vmem:[#allocation2 + $0x24] ss:$16 sps:$4 sm:$0xff]   ;;  %v928_v8 = vld [vmem:[#allocation2 + $0x2c] ss:$16 sps:$4 sm:$0xff]  }
  0x4e   :  { %551 = vmatprep.subr.bf16.mxu1 %v922_v4  ;;  %509 = vmatpush1.bf16.msra.mxu0 %v924_v5  ;;  %v930_v9 = vld [vmem:[#allocation2 + $0x20] ss:$16 sps:$4 sm:$0xff]   ;;  %v931_v10 = vld [vmem:[#allocation2 + $0x28] ss:$16 sps:$4 sm:$0xff]   ;;  %v932_v11 = vld [vmem:[#allocation2 + $0x44] ss:$16 sps:$4 sm:$0xff]  }
  0x4f   :  { %552 = vmatpush1.bf16.msra.mxu1 %v925_v6  ;;  %510 = vmatprep.subr.bf16.mxu0 %v926_v7  ;;  %v934_v12 = vld [vmem:[#allocation2 + $0x4c] ss:$16 sps:$4 sm:$0xff]   ;;  %v936_v13 = vld [vmem:[#allocation2 + $0x40] ss:$16 sps:$4 sm:$0xff]   ;;  %v937_v14 = vld [vmem:[#allocation2 + $0x48] ss:$16 sps:$4 sm:$0xff]   ;;  %v84_v6 = vlaneseq }
  0x50   :  { %553 = vmatprep.subr.bf16.mxu1 %v928_v8  ;;  %v938_v15 = vld [vmem:[#allocation2 + $0x64] ss:$16 sps:$4 sm:$0xff]   ;;  %v940_v16 = vld [vmem:[#allocation2 + $0x6c] ss:$16 sps:$4 sm:$0xff]   ;;  %v942_v17 = vld [vmem:[#allocation2 + $0x60] ss:$16 sps:$4 sm:$0xff]  }
  0x51   :  { %90 = vperm.xlu0 %919, %v83_v2   ;;  %v943_v18 = vld [vmem:[#allocation2 + $0x68] ss:$16 sps:$4 sm:$0xff]   ;;  %v944_v19 = vld [vmem:[#allocation2 + $0x84] ss:$16 sps:$4 sm:$0xff]   ;;  %v946_v20 = vld [vmem:[#allocation2 + $0x8c] ss:$16 sps:$4 sm:$0xff]  }
  0x52   :  { %511 = vmatpush1.bf16.msra.mxu0 %v930_v9  ;;  %v948_v21 = vld [vmem:[#allocation2 + $0x80] ss:$16 sps:$4 sm:$0xff]   ;;  %v949_v22 = vld [vmem:[#allocation2 + $0x88] ss:$16 sps:$4 sm:$0xff]   ;;  %v950_v23 = vld [vmem:[#allocation2 + $0xa4] ss:$16 sps:$4 sm:$0xff]  }
  0x53   :  { %554 = vmatpush1.bf16.msra.mxu1 %v931_v10  ;;  %512 = vmatprep.subr.bf16.mxu0 %v932_v11  ;;  %v952_v24 = vld [vmem:[#allocation2 + $0xac] ss:$16 sps:$4 sm:$0xff]   ;;  %v954_v25 = vld [vmem:[#allocation2 + $0xa0] ss:$16 sps:$4 sm:$0xff]   ;;  %v955_v26 = vld [vmem:[#allocation2 + $0xa8] ss:$16 sps:$4 sm:$0xff]  }
  0x54   :  { %555 = vmatprep.subr.bf16.mxu1 %v934_v12  ;;  %v956_v27 = vld [vmem:[#allocation2 + $0xc4] ss:$16 sps:$4 sm:$0xff]   ;;  %v958_v28 = vld [vmem:[#allocation2 + $0xcc] ss:$16 sps:$4 sm:$0xff]   ;;  %v960_v29 = vld [vmem:[#allocation2 + $0xc0] ss:$16 sps:$4 sm:$0xff]  }
  0x55   :  { %v961_v30 = vld [vmem:[#allocation2 + $0xc8] ss:$16 sps:$4 sm:$0xff]   ;;  %v962_v31 = vld [vmem:[#allocation2 + $0xe4] ss:$16 sps:$4 sm:$0xff]   ;;  %v964_v32 = vld [vmem:[#allocation2 + $0xec] ss:$16 sps:$4 sm:$0xff]  }
  0x56   :  { %513 = vmatpush1.bf16.msra.mxu0 %v936_v13  ;;  %v966_v33 = vld [vmem:[#allocation2 + $0xe0] ss:$16 sps:$4 sm:$0xff]   ;;  %v967_v34 = vld [vmem:[#allocation2 + $0xe8] ss:$16 sps:$4 sm:$0xff]   ;;  %v968_v35 = vld [vmem:[#allocation2 + $0x104] ss:$16 sps:$4 sm:$0xff]  }
  0x57   :  { %556 = vmatpush1.bf16.msra.mxu1 %v937_v14  ;;  %514 = vmatprep.subr.bf16.mxu0 %v938_v15  ;;  %v970_v36 = vld [vmem:[#allocation2 + $0x10c] ss:$16 sps:$4 sm:$0xff]   ;;  %v972_v37 = vld [vmem:[#allocation2 + $0x100] ss:$16 sps:$4 sm:$0xff]   ;;  %v973_v38 = vld [vmem:[#allocation2 + $0x108] ss:$16 sps:$4 sm:$0xff]  }
  0x58   :  { %557 = vmatprep.subr.bf16.mxu1 %v940_v16  ;;  %v974_v39 = vld [vmem:[#allocation2 + $0x124] ss:$16 sps:$4 sm:$0xff]   ;;  %v976_v40 = vld [vmem:[#allocation2 + $0x12c] ss:$16 sps:$4 sm:$0xff]   ;;  %v978_v41 = vld [vmem:[#allocation2 + $0x120] ss:$16 sps:$4 sm:$0xff]  }
  0x59   :  { %v979_v42 = vld [vmem:[#allocation2 + $0x128] ss:$16 sps:$4 sm:$0xff]   ;;  %v980_v43 = vld [vmem:[#allocation2 + $0x144] ss:$16 sps:$4 sm:$0xff]   ;;  %v982_v44 = vld [vmem:[#allocation2 + $0x14c] ss:$16 sps:$4 sm:$0xff]  }
  0x5a   :  { %515 = vmatpush1.bf16.msra.mxu0 %v942_v17  ;;  %v984_v45 = vld [vmem:[#allocation2 + $0x140] ss:$16 sps:$4 sm:$0xff]   ;;  %v985_v46 = vld [vmem:[#allocation2 + $0x148] ss:$16 sps:$4 sm:$0xff]   ;;  %v986_v47 = vld [vmem:[#allocation2 + $0x164] ss:$16 sps:$4 sm:$0xff]  }
  0x5b   :  { %558 = vmatpush1.bf16.msra.mxu1 %v943_v18  ;;  %516 = vmatprep.subr.bf16.mxu0 %v944_v19  ;;  %v988_v48 = vld [vmem:[#allocation2 + $0x16c] ss:$16 sps:$4 sm:$0xff]   ;;  %v990_v49 = vld [vmem:[#allocation2 + $0x160] ss:$16 sps:$4 sm:$0xff]   ;;  %v991_v50 = vld [vmem:[#allocation2 + $0x168] ss:$16 sps:$4 sm:$0xff]  }
  0x5c   :  { %559 = vmatprep.subr.bf16.mxu1 %v946_v20  ;;  %v992_v51 = vld [vmem:[#allocation2 + $0x184] ss:$16 sps:$4 sm:$0xff]   ;;  %v100_v53 = vld [vmem:[%s1337_s1 + $0x8] sm:$0xff]  ;;  %v996_v56 = vld [vmem:[#allocation2 + $0x180] ss:$16 sps:$4 sm:$0xff]   ;;  %v85_v8 = vand.u32 127, %v84_v6 }
  0x5d   :  { %v99_v52 = vld [vmem:[%s1337_s1] sm:$0xff]  ;;  %v994_v54 = vld [vmem:[#allocation2 + $0x18c] ss:$16 sps:$4 sm:$0xff]   ;;  %v997_v57 = vld [vmem:[#allocation2 + $0x188] ss:$16 sps:$4 sm:$0xff]   ;;  %v1184_v12 = vmov 0.0  }
  0x5e   :  { %517 = vmatpush1.bf16.msra.mxu0 %v948_v21  ;;  %v101_v55 = vpack.c.bf16 %v100_v53, %v99_v52  ;;  %v998_v58 = vld [vmem:[#allocation2 + $0x1a4] ss:$16 sps:$4 sm:$0xff]   ;;  %v1000_v59 = vld [vmem:[#allocation2 + $0x1ac] ss:$16 sps:$4 sm:$0xff]   ;;  %v1002_v60 = vld [vmem:[#allocation2 + $0x1a0] ss:$16 sps:$4 sm:$0xff]  }
  0x5f   :  { %560 = vmatpush1.bf16.msra.mxu1 %v949_v22  ;;  %518 = vmatprep.subr.bf16.mxu0 %v950_v23  ;;  %v1003_v61 = vld [vmem:[#allocation2 + $0x1a8] ss:$16 sps:$4 sm:$0xff]   ;;  %v1004_v62 = vld [vmem:[#allocation2 + $0x1c4] ss:$16 sps:$4 sm:$0xff]   ;;  %v1006_v63 = vld [vmem:[#allocation2 + $0x1cc] ss:$16 sps:$4 sm:$0xff]  }
  0x60   :  { %561 = vmatprep.subr.bf16.mxu1 %v952_v24  ;;  %540 = vmatprep.mubr.bf16.mxu0 %v101_v55  ;;  %v1008_v0 = vld [vmem:[#allocation2 + $0x1c0] ss:$16 sps:$4 sm:$0xff]   ;;  %v1009_v1 = vld [vmem:[#allocation2 + $0x1c8] ss:$16 sps:$4 sm:$0xff]   ;;  %v1010_v2 = vld [vmem:[#allocation2 + $0x1e4] ss:$16 sps:$4 sm:$0xff]  }
  0x61   :  { %583 = vmatprep.mubr.bf16.mxu1 %v101_v55  ;;  %v1012_v3 = vld [vmem:[#allocation2 + $0x1ec] ss:$16 sps:$4 sm:$0xff]   ;;  %v1014_v4 = vld [vmem:[#allocation2 + $0x1e0] ss:$16 sps:$4 sm:$0xff]   ;;  %v1015_v5 = vld [vmem:[#allocation2 + $0x1e8] ss:$16 sps:$4 sm:$0xff]  }
  0x62   :  { %519 = vmatpush1.bf16.msra.mxu0 %v954_v25  ;;  %v1183_v10 = vmov 1.0|1.0   ;;  %v1016_v11 = vld [vmem:[#allocation7] sm:$0xff]   ;;  %v1017_v13 = vld [vmem:[#allocation7 + $0x8] sm:$0xff]   ;;  %v1018_v14 = vld [vmem:[#allocation7 + $0x10] sm:$0xff]   ;;  %v169_v20 = vshrl.u32 %v84_v6, 7 }
  0x63   :  { %562 = vmatpush1.bf16.msra.mxu1 %v955_v26  ;;  %520 = vmatprep.subr.bf16.mxu0 %v956_v27  ;;  %v1019_v15 = vld [vmem:[#allocation7 + $0x18] sm:$0xff]   ;;  %v1020_v16 = vld [vmem:[#allocation7 + $0x20] sm:$0xff]   ;;  %v1021_v17 = vld [vmem:[#allocation7 + $0x28] sm:$0xff]   ;;  %s1186_s4 = smov [#allocation10]  }
  0x64   :  { %563 = vmatprep.subr.bf16.mxu1 %v958_v28  ;;  %v1022_v18 = vld [vmem:[#allocation7 + $0x30] sm:$0xff]   ;;  %v1023_v19 = vld [vmem:[#allocation7 + $0x38] sm:$0xff]   ;;  %v170_v21 = vsub.s32 0, %v169_v20  ;;  %v178_v22 = vsub.s32 2, %v169_v20  ;;  %v174_v24 = vsub.s32 1, %v169_v20  ;;  %v182_v25 = vsub.s32 3, %v169_v20 }
  0x65   :  { %v166_v23 = vld [vmem:[#allocation5] sm:$0xf] }
  0x66   :  { %521 = vmatpush1.bf16.msra.mxu0 %v960_v29  ;;  %v171_v26 = vrot.slane %v166_v23, %v170_v21  ;;  %v179_v27 = vrot.slane %v166_v23, %v178_v22  ;;  %v175_v28 = vrot.slane %v166_v23, %v174_v24  ;;  %v183_v29 = vrot.slane %v166_v23, %v182_v25  ;;  %v866_v21 = vld [vmem:[#allocation8] ss:$0 sm:$0xff] }
  0x67   :  { %564 = vmatpush1.bf16.msra.mxu1 %v961_v30  ;;  %522 = vmatprep.subr.bf16.mxu0 %v962_v31 }
  0x68   :  { %565 = vmatprep.subr.bf16.mxu1 %v964_v32 }
  0x6a   :  { %523 = vmatpush1.bf16.msra.mxu0 %v966_v33 }
  0x6b   :  { %566 = vmatpush1.bf16.msra.mxu1 %v967_v34  ;;  %524 = vmatprep.subr.bf16.mxu0 %v968_v35 }
  0x6c   :  { %567 = vmatprep.subr.bf16.mxu1 %v970_v36 }
  0x6e   :  { %525 = vmatpush1.bf16.msra.mxu0 %v972_v37 }
  0x6f   :  { %568 = vmatpush1.bf16.msra.mxu1 %v973_v38  ;;  %526 = vmatprep.subr.bf16.mxu0 %v974_v39 }
  0x70   :  { %569 = vmatprep.subr.bf16.mxu1 %v976_v40 }
  0x72   :  { %527 = vmatpush1.bf16.msra.mxu0 %v978_v41 }
  0x73   :  { %570 = vmatpush1.bf16.msra.mxu1 %v979_v42  ;;  %528 = vmatprep.subr.bf16.mxu0 %v980_v43 }
  0x74   :  { %571 = vmatprep.subr.bf16.mxu1 %v982_v44 }
  0x76   :  { %529 = vmatpush1.bf16.msra.mxu0 %v984_v45 }
  0x77   :  { %572 = vmatpush1.bf16.msra.mxu1 %v985_v46  ;;  %530 = vmatprep.subr.bf16.mxu0 %v986_v47 }
  0x78   :  { %573 = vmatprep.subr.bf16.mxu1 %v988_v48 }
  0x7a   :  { %531 = vmatpush1.bf16.msra.mxu0 %v990_v49 }
  0x7b   :  { %574 = vmatpush1.bf16.msra.mxu1 %v991_v50  ;;  %532 = vmatprep.subr.bf16.mxu0 %v992_v51 }
  0x7c   :  { %575 = vmatprep.subr.bf16.mxu1 %v994_v54 }
  0x7e   :  { %533 = vmatpush1.bf16.msra.mxu0 %v996_v56 }
  0x7f   :  { %576 = vmatpush1.bf16.msra.mxu1 %v997_v57  ;;  %534 = vmatprep.subr.bf16.mxu0 %v998_v58 }
  0x80   :  { %577 = vmatprep.subr.bf16.mxu1 %v1000_v59 }
  0x82   :  { %535 = vmatpush1.bf16.msra.mxu0 %v1002_v60 }
  0x83   :  { %578 = vmatpush1.bf16.msra.mxu1 %v1003_v61  ;;  %536 = vmatprep.subr.bf16.mxu0 %v1004_v62 }
  0x84   :  { %579 = vmatprep.subr.bf16.mxu1 %v1006_v63 }
  0x86   :  { %537 = vmatpush1.bf16.msra.mxu0 %v1008_v0  ;;  %v632_v0 = vld [vmem:[%s1338_s2] sm:$0xff] }
  0x87   :  { %580 = vmatpush1.bf16.msra.mxu1 %v1009_v1  ;;  %538 = vmatprep.subr.bf16.mxu0 %v1010_v2 }
  0x88   :  { %581 = vmatprep.subr.bf16.mxu1 %v1012_v3 }
  0x8a   :  { %539 = vmatpush1.bf16.msra.mxu0 %v1014_v4 }
  0x8b   :  { %582 = vmatpush1.bf16.msra.mxu1 %v1015_v5  ;;  %884 = vmatprep.subr.bf16.mxu0 %v1184_v12 }
  0xcc   :  { %v88_v7 = vpop.permute.xlu0 %87 }
  0xcd   :  { %vm92_vm0 = vcmp.eq.s32.totalorder %v85_v8, %v88_v7  ;;  %v633_v7 = vld [vmem:[%s1338_s2 + $0x8] sm:$0xff] }
  0xd0   :  { %v91_v9 = vpop.permute.xlu0 %90 }
  0xd1   :  { %vm93_vm1 = vcmp.eq.s32.totalorder %v85_v8, %v91_v9 }
  0xd2   :  { %vm856_vm2 = vmpackc.low %vm93_vm1, %vm92_vm0 }
  0xd3   :  { %857 = vmatmul.mubr.msk.bf16.vlgmr.msra.gmra.mrb[0].mxu0 %vm856_vm2, %v1183_v10  ;;  %859 = vmatmul.mubr.msk.bf16.vlgmr.msra.gmra.mrb[0].mxu1 %vm856_vm2, %v1183_v10 }
  0xd4   :  { %885 = vmatpush3.bf16.msra.mxu0 %v1016_v11  ;;  %900 = vmatprep.mubr.msk.bf16.mxu0 %vm1185_vm3, %v1184_v12 }
  0xd5   :  { %886 = vmatprep.subr.bf16.mxu0 %v1184_v12 }
  0xd8   :  { %887 = vmatpush3.bf16.msra.mxu0 %v1017_v13 }
  0xd9   :  { %888 = vmatprep.subr.bf16.mxu0 %v1184_v12 }
  0xdc   :  { %889 = vmatpush3.bf16.msra.mxu0 %v1018_v14 }
  0xdd   :  { %890 = vmatprep.subr.bf16.mxu0 %v1184_v12 }
  0xe0   :  { %891 = vmatpush3.bf16.msra.mxu0 %v1019_v15 }
  0xe1   :  { %892 = vmatprep.subr.bf16.mxu0 %v1184_v12 }
  0xe4   :  { %893 = vmatpush3.bf16.msra.mxu0 %v1020_v16 }
  0xe5   :  { %894 = vmatprep.subr.bf16.mxu0 %v1184_v12 }
  0xe8   :  { %895 = vmatpush3.bf16.msra.mxu0 %v1021_v17 }
  0xe9   :  { %896 = vmatprep.subr.bf16.mxu0 %v1184_v12 }
  0xec   :  { %897 = vmatpush3.bf16.msra.mxu0 %v1022_v18 }
  0xed   :  { %898 = vmatprep.subr.bf16.mxu0 %v1184_v12 }
  0xf0   :  { %899 = vmatpush3.bf16.msra.mxu0 %v1023_v19 }
 0x1a6   :  { %v542_v30 = vpop.f32.mrb[0].mxu0  ;;  %v585_v31 = vpop.f32.mrb[0].mxu1 }
 0x1a7   :  { %v543_v32 = vadd.f32 %v542_v30, %v171_v26  ;;  %v586_v33 = vadd.f32 %v585_v31, %v179_v27  ;;  %v544_v34 = vpop.f32.mrb[1].mxu0  ;;  %v587_v35 = vpop.f32.mrb[1].mxu1 }
 0x1a8   :  { %v545_v36 = vadd.f32 %v544_v34, %v175_v28  ;;  %v588_v37 = vadd.f32 %v587_v35, %v183_v29  ;;  %v546_v38 = vpop.f32.mrb[2].mxu0  ;;  %v589_v39 = vpop.f32.mrb[2].mxu1 }
 0x1a9   :  { %v860_v40 = vmul.f32 -1.442695, %v543_v32  ;;  %v547_v41 = vadd.f32 %v546_v38, %v171_v26  ;;  %v590_v42 = vadd.f32 %v589_v39, %v179_v27  ;;  %v548_v43 = vpop.f32.mrb[3].mxu0  ;;  %v591_v44 = vpop.f32.mrb[3].mxu1  ;;  %v862_v50 = vmul.f32 -1.442695, %v586_v33 }
 0x1aa   :  { %v861_v45 = vmul.f32 -1.442695, %v545_v36  ;;  %v549_v46 = vadd.f32 %v548_v43, %v175_v28  ;;  %v592_v47 = vadd.f32 %v591_v44, %v183_v29 }
 0x1ab   :  { %1024 = vpow2.f32 %v860_v40  ;;  %v863_v48 = vmul.f32 -1.442695, %v547_v41  ;;  %v865_v51 = vmul.f32 -1.442695, %v590_v42 }
 0x1ac   :  { %v864_v49 = vmul.f32 -1.442695, %v549_v46  ;;  %1026 = vpow2.f32 %v861_v45 }
 0x1ad   :  { %1028 = vpow2.f32 %v863_v48 }
 0x1ae   :  { %1030 = vpow2.f32 %v864_v49 }
 0x1af   :  { %1032 = vtanh.f32 %v588_v37 }
 0x1b0   :  { %1034 = vpow2.f32 %v862_v50 }
 0x1b1   :  { %1036 = vpow2.f32 %v865_v51 }
 0x1b5   :  { %v1025_v52 = vpop.eup %1024 }
 0x1b6   :  { %v612_v53 = vadd.f32 1.0, %v1025_v52  ;;  %v1027_v54 = vpop.eup %1026 }
 0x1b7   :  { %v1029_v55 = vpop.eup %1028  ;;  %v613_v56 = vadd.f32 1.0, %v1027_v54 }
 0x1b8   :  { %1038 = vrcp.f32 %v612_v53  ;;  %v615_v57 = vadd.f32 1.0, %v1029_v55  ;;  %v1031_v58 = vpop.eup %1030 }
 0x1b9   :  { %1040 = vtanh.f32 %v592_v47  ;;  %v616_v59 = vadd.f32 1.0, %v1031_v58  ;;  %v1033_v60 = vpop.eup %1032 }
 0x1ba   :  { %1042 = vrcp.f32 %v613_v56  ;;  %v1035_v61 = vpop.eup %1034 }
 0x1bb   :  { %1044 = vrcp.f32 %v615_v57  ;;  %v1037_v62 = vpop.eup %1036  ;;  %v614_v4 = vadd.f32 1.0, %v1035_v61 }
 0x1bc   :  { %1046 = vrcp.f32 %v616_v59  ;;  %v617_v11 = vadd.f32 1.0, %v1037_v62 }
 0x1bd   :  { %1048 = vrcp.f32 %v614_v4 }
 0x1c2   :  { %v1039_v63 = vpop.eup %1038 }
 0x1c3   :  { %v1041_v1 = vpop.eup %1040  ;;  %v636_v2 = vmul.f32 %v1039_v63, %v1033_v60 }
 0x1c4   :  { %v1043_v3 = vpop.eup %1042 }
 0x1c5   :  { %v1045_v5 = vpop.eup %1044  ;;  %v634_v6 = vmul.f32 %v1043_v3, %v632_v0 }
 0x1c6   :  { %v637_v8 = vmul.f32 %v1045_v5, %v1041_v1  ;;  %v1047_v9 = vpop.eup %1046 }
 0x1c7   :  { %v638_v10 = vadd.f32 %v636_v2, %v634_v6  ;;  %v635_v12 = vmul.f32 %v1047_v9, %v633_v7  ;;  %v1049_v14 = vpop.eup %1048 }
 0x1c9   :  { %1050 = vtanh.f32 %v638_v10  ;;  %644 = vst [vmem:[%s1345_s9] sm:$0xff] %v638_v10  ;;  %v639_v13 = vadd.f32 %v637_v8, %v635_v12 }
 0x1ca   :  { %1052 = vrcp.f32 %v617_v11 }
 0x1cb   :  { %1054 = vtanh.f32 %v639_v13  ;;  %645 = vst [vmem:[%s1345_s9 + $0x8] sm:$0xff] %v639_v13  ;;  %s768_s9 = sshll.u32 %s1186_s4, 4  ;;  %s769_s9 = int_to_ptr.vmem [resolvable:$true] %s768_s9 }
 0x1cc   :  { %s1144_s10 = scalar_lea.vmem %s769_s9, 256  ;;  %p1149_p5 = scmp.lt.s32.totalorder %s769_s9, %s769_s9 }
 0x1cd   :  { %p1145_p4 = scmp.ne.s32.totalorder %s769_s9, %s1144_s10  ;;  %p1150_p6 = scmp.lt.s32.totalorder %s1144_s10, %s1144_s10 }
 0x1cf   :  { %p1151_p7 = por %p1150_p6, %p1149_p5 }
 0x1d1   :  { %p1152_p8 = pnand %p1151_p7, %p1145_p4 }
 0x1d3   :  { %v1051_v15 = vpop.eup %1050 }
 0x1d4   :  { %v642_v16 = vmul.f32 %v1051_v15, %v1049_v14  ;;  %v1053_v17 = vpop.eup %1052 }
 0x1d5   :  { %v1055_v18 = vpop.eup %1054 }
 0x1d6   :  { %646 = vst [vmem:[%s1344_s8] sm:$0xff] %v642_v16  ;;  %v643_v19 = vmul.f32 %v1055_v18, %v1053_v17 }
 0x1d8   :  { %647 = vst [vmem:[%s1344_s8 + $0x8] sm:$0xff] %v643_v19  ;;  %v648_v20 = vpack.c.bf16 %v643_v19, %v642_v16 }
 0x1da   :  { %901 = vmatmul.mubr.bf16.vlgmr.msra.gmra.mrb[4].mxu0 %v648_v20 }
 0x2ad   :  { %v754_v22 = vpop.f32.mrb[4].mxu0 }
 0x2ae   :  { %v755_v23 = vadd.f32 %v866_v21, %v754_v22  ;;  %v902_v24 = vpop.f32.mrb[5].mxu0 }
 0x2af   :  { %v757_v25 = vpop.f32.mrb[6].mxu0 }
 0x2b0   :  { %761 = vst [vmem:[#allocation10] sm:$0xff] %v755_v23  ;;  %v758_v26 = vadd.f32 %v866_v21, %v757_v25  ;;  %v903_v27 = vpop.f32.mrb[7].mxu0 }
 0x2b2   :  { %762 = vst [vmem:[#allocation10 + $0x8] sm:$0xff] %v758_v26 }
 0x2b3   :  { %1155 = shalt.err (!%p1152_p8)
}
 0x2b4   :  { %s1156_s13 = scalar_lea.hbm %s1343_s7, 256 }
 0x2b5   :  { %p1157_p9 = scmp.ne.s32.totalorder %s1343_s7, %s1156_s13  ;;  %p1160_p10 = scmp.lt.u32.totalorder %s1156_s13, %s1343_s7 }
 0x2b7   :  { %p1162_p11 = pnand %p1160_p10, %p1157_p9 }
 0x2b9   :  { %1165 = shalt.err (!%p1162_p11)
}
 0x2ba   :  { %s1187_s17 = smov 128   ;;  %s1188_s18 = smov 8  }
 0x2bb   :  { %774 = dma.vmem_to_hbm [thread:$0]  %s769_s9, 256, %s1343_s7, [#allocation4], %s1187_s17, %s1187_s17, %s1188_s18  }
 0x2bc   :  { %1172 = dma.done.wait [#allocation4], 256  }
 0x2bd   :  { %1173 = vsyncadd [#allocation4], 4294967040 }
 0x2be   :  { %786 = vsyncpa [#allocation3], 1 }
 0x2bf   :  { %787 = vsyncpa [#allocation6], 1 }
 0x2c0   :  { %788 = vsyncpa [#allocation9], 1 }
 0x2c1   :  { %789 = vsyncpa [#allocation4], 1 }

</bundles_post_ra>
